<compile_context>
chip_gen: v5e
topology: v5e:2x2
jax: 0.10.0
libtpu: 0.0.40
codegen_flags: <defaults>
</compile_context>

<pallas_src>
import functools

import jax
import jax.numpy as jnp
from jax import lax
from jax.experimental import pallas as pl
from jax.experimental.pallas import tpu as pltpu

MARGIN = 0.2        # float margin -> clamp(x + m, min=0)
ALPHA = 1.0         # weight of the cross-entropy term
ALMOST_INF = 9999.9
_BIG = 3.0e38       # large finite f32: min-identity / "masked out" sentinel
_LANE = 128


def _round_up(n, m):
    return ((n + m - 1) // m) * m


def _pick_tile(n, max_tile):
    """Largest power-of-two multiple of 128 that divides `n` and is <= max_tile."""
    best = _LANE
    t = _LANE
    limit = min(n, max(max_tile, _LANE))
    while t <= limit:
        if n % t == 0:
            best = t
        t *= 2
    return best


# -----------------------------------------------------------------------------
# Kernel 1: cross-entropy summed over heads, mean over the (real) batch.
# grid = (H, Bp // tile_b); the (1,1) output block index is constant, so it is
# an accumulator across both (arbitrary) grid axes.
# -----------------------------------------------------------------------------
def _ce_kernel(logits_ref, pids_ref, out_ref, *, b_real, c_real):
    h = pl.program_id(0)
    jb = pl.program_id(1)

    @pl.when(jnp.logical_and(h == 0, jb == 0))
    def _init():
        out_ref[...] = jnp.zeros(out_ref.shape, jnp.float32)

    logits = logits_ref[0].astype(jnp.float32)            # (tile_b, Cp)
    pid = pids_ref[...]                                   # (tile_b, 1) int32
    tile_b, c_pad = logits.shape

    cls = lax.broadcasted_iota(jnp.int32, (tile_b, c_pad), 1)
    # padded classes must not contribute to the logsumexp
    logits = jnp.where(cls < c_real, logits, -_BIG)

    m = jnp.max(logits, axis=-1, keepdims=True)                          # (tile_b,1)
    lse = jnp.log(jnp.sum(jnp.exp(logits - m), axis=-1, keepdims=True)) + m
    # select (not one-hot multiply): logit of the target class
    tgt = jnp.sum(jnp.where(cls == pid, logits, 0.0), axis=-1, keepdims=True)

    row = jb * tile_b + lax.broadcasted_iota(jnp.int32, (tile_b, 1), 0)
    row_valid = jnp.where(row < b_real, 1.0, 0.0)          # mask padded batch rows
    out_ref[...] += jnp.sum((lse - tgt) * row_valid, keepdims=True) * (1.0 / b_real)


# -----------------------------------------------------------------------------
# Kernel 2: batch-hard triplet term, column-tiled, fused with the CE scalar.
# grid = (Bp // tile_j  [output columns, parallel],
#         Bp // tile_i  [reduction rows, arbitrary, trailing])
# -----------------------------------------------------------------------------
def _bh_kernel(ce_ref, dist_ref, pids_j_ref, pids_i_ref, out_ref,
               fp_acc, fn_acc, *, b_real, margin, alpha):
    i = pl.program_id(1)
    tile_i = dist_ref.shape[0]

    @pl.when(i == 0)
    def _init():
        fp_acc[...] = jnp.full(fp_acc.shape, -_BIG, jnp.float32)
        fn_acc[...] = jnp.full(fn_acc.shape, _BIG, jnp.float32)

    dist = dist_ref[...].astype(jnp.float32)               # (tile_i, tile_j)
    p_j = pids_j_ref[...]                                  # (1, tile_j): pids of output cols
    p_i = pids_i_ref[...]                                  # (tile_i, 1): pids of reduction rows

    row = i * tile_i + lax.broadcasted_iota(jnp.int32, (tile_i, 1), 0)
    row_valid = row < b_real                               # mask padded rows of dist
    maskf = jnp.where(jnp.logical_and(p_i == p_j, row_valid), 1.0, 0.0)

    fp_acc[...] = jnp.maximum(fp_acc[...],
                              jnp.max(dist * maskf, axis=0, keepdims=True))
    fn_cand = jnp.where(row_valid, dist + ALMOST_INF * maskf, _BIG)
    fn_acc[...] = jnp.minimum(fn_acc[...],
                              jnp.min(fn_cand, axis=0, keepdims=True))

    @pl.when(i == pl.num_programs(1) - 1)
    def _finalize():
        bh = jnp.maximum(fp_acc[...] - fn_acc[...] + margin, 0.0)
        out_ref[...] = bh + alpha * ce_ref[0, 0]


def batch_hard_with_softmax(dist, pids, soft_logits, *, margin=MARGIN, alpha=ALPHA):
    """dist: (B,B), pids: (B,), soft_logits: (H,B,C) -> (B,) f32 loss vector."""
    B = dist.shape[0]
    H, B2, C = soft_logits.shape
    assert B2 == B and pids.shape == (B,)

    Bp = _round_up(B, _LANE)
    Cp = _round_up(C, _LANE)

    # Lane-dense padding (pad values are inert: kernels mask by index, padded
    # output columns are sliced off below). No dtype upcast here.
    dist_p = jnp.pad(dist, ((0, Bp - B), (0, Bp - B)))
    logits_p = jnp.pad(soft_logits, ((0, 0), (0, Bp - B), (0, Cp - C)))
    pids_p = jnp.pad(pids.astype(jnp.int32), (0, Bp - B), constant_values=-1)
    pids_row = pids_p.reshape(1, Bp)     # pids of the output columns (lane axis)
    pids_col = pids_p.reshape(Bp, 1)     # pids of the reduction rows (sublane axis)

    # ---- cross-entropy scalar, computed once -------------------------------
    bytes_per_row = Cp * jnp.dtype(logits_p.dtype).itemsize
    tile_b = _pick_tile(Bp, max(_LANE, (4 * 1024 * 1024) // max(bytes_per_row, 1)))
    ce = pl.pallas_call(
        functools.partial(_ce_kernel, b_real=B, c_real=C),
        out_shape=jax.ShapeDtypeStruct((1, 1), jnp.float32),
        grid_spec=pltpu.PrefetchScalarGridSpec(
            num_scalar_prefetch=0,
            grid=(H, Bp // tile_b),
            in_specs=[
                pl.BlockSpec((1, tile_b, Cp), lambda h, jb: (h, jb, 0)),
                pl.BlockSpec((tile_b, 1), lambda h, jb: (jb, 0)),
            ],
            out_specs=pl.BlockSpec((1, 1), lambda h, jb: (0, 0)),
        ),
        compiler_params=pltpu.CompilerParams(
            dimension_semantics=("arbitrary", "arbitrary"),
            vmem_limit_bytes=32 * 1024 * 1024),
    )(logits_p, pids_col)

    # ---- batch-hard, column-tiled grid, combine with CE --------------------
    tile_j = _pick_tile(Bp, 512)
    tile_i = _pick_tile(Bp, 512)
    out = pl.pallas_call(
        functools.partial(_bh_kernel, b_real=B, margin=margin, alpha=alpha),
        out_shape=jax.ShapeDtypeStruct((1, Bp), jnp.float32),
        grid_spec=pltpu.PrefetchScalarGridSpec(
            num_scalar_prefetch=0,
            grid=(Bp // tile_j, Bp // tile_i),       # (output cols, reduction rows)
            in_specs=[
                pl.BlockSpec(memory_space=pltpu.MemorySpace.SMEM),    # ce scalar
                pl.BlockSpec((tile_i, tile_j), lambda j, i: (i, j)),  # dist tile
                pl.BlockSpec((1, tile_j), lambda j, i: (0, j)),       # pids of cols
                pl.BlockSpec((tile_i, 1), lambda j, i: (i, 0)),       # pids of rows
            ],
            out_specs=pl.BlockSpec((1, tile_j), lambda j, i: (0, j)),
            scratch_shapes=[
                pltpu.VMEM((1, tile_j), jnp.float32),   # running max (furthest positive)
                pltpu.VMEM((1, tile_j), jnp.float32),   # running min (furthest negative)
            ],
        ),
        compiler_params=pltpu.CompilerParams(
            dimension_semantics=("parallel", "arbitrary"),
            vmem_limit_bytes=32 * 1024 * 1024),
    )(ce, dist_p, pids_row, pids_col)

    return out[0, :B]


def _reference(dist, pids, soft_logits):
    mask_pos = (pids[None, :] == pids[:, None]).astype(jnp.float32)
    fp = jnp.max(dist * mask_pos, axis=0)
    fn = jnp.min(dist + ALMOST_INF * mask_pos, axis=0)
    bh = jnp.maximum(fp - fn + MARGIN, 0.0)
    ce = 0.0
    for h in range(soft_logits.shape[0]):
        logits = soft_logits[h]
        lse = jax.scipy.special.logsumexp(logits, axis=-1)
        tgt = jnp.take_along_axis(logits, pids[:, None].astype(jnp.int32), axis=-1)[:, 0]
        ce += jnp.mean(lse - tgt)
    return bh + ALPHA * ce


if __name__ == "__main__":
    B, D, C, H = 8, 32, 16, 2    # batch, embedding dim, num classes, num softmax heads
    key = jax.random.PRNGKey(0)
    k_emb, k_pid, k_log = jax.random.split(key, 3)

    emb = jax.random.normal(k_emb, (B, D), dtype=jnp.float32)
    # All-to-all Euclidean distance matrix built with the Gram-matrix (MXU) form
    # instead of a (B,B,D) broadcast-subtract (see TODO above re: full fusion).
    sq = jnp.sum(emb * emb, axis=-1)
    gram = jnp.dot(emb, emb.T, preferred_element_type=jnp.float32)
    dist = jnp.sqrt(jnp.maximum(sq[:, None] + sq[None, :] - 2.0 * gram, 0.0) + 1e-12)

    pids = jax.random.randint(k_pid, (B,), 0, 4, dtype=jnp.int32)
    soft_logits = jax.random.normal(k_log, (H, B, C), dtype=jnp.float32)  # endpoints['soft']

    out = jax.block_until_ready(batch_hard_with_softmax(dist, pids, soft_logits))
    ref = jax.block_until_ready(_reference(dist, pids, soft_logits))

    assert out.shape == (B,)
    assert jnp.allclose(out, ref, atol=1e-4, rtol=1e-4), (out, ref)

    print("KERNEL_OK")
</pallas_src>

<mosaic_0001>
module attributes {stable_mosaic.version = 11 : i64} {
  func.func @_ce_kernel(%arg0: i32, %arg1: i32, %arg2: memref<1x128x128xf32, #tpu.memory_space<vmem>>, %arg3: memref<128x1xi32, #tpu.memory_space<vmem>>, %arg4: memref<1x1xf32, #tpu.memory_space<vmem>>) attributes {dimension_semantics = [#tpu.dimension_semantics<arbitrary>, #tpu.dimension_semantics<arbitrary>], iteration_bounds = array<i64: 2, 1>, scalar_prefetch = 0 : i64, scratch_operands = 0 : i64, tpu.core_type = #tpu.core_type<tc>, window_params = [{transform_indices = @transform_0, window_bounds = array<i64: 1, 128, 128>}, {transform_indices = @transform_1, window_bounds = array<i64: 128, 1>}, {pipeline_mode = #tpu.pipeline_mode<synchronous>, transform_indices = @transform_2, window_bounds = array<i64: 1, 1>}]} {
    %c0_i32 = arith.constant 0 : i32
    %0 = arith.cmpi eq, %arg0, %c0_i32 : i32
    %c0_i32_0 = arith.constant 0 : i32
    %1 = arith.cmpi eq, %arg1, %c0_i32_0 : i32
    %2 = arith.andi %0, %1 : i1
    %3 = arith.extui %2 : i1 to i32
    %c0_i32_1 = arith.constant 0 : i32
    %4 = arith.cmpi ne, %3, %c0_i32_1 : i32
    scf.if %4 {
      %cst_18 = arith.constant 0.000000e+00 : f32
      %49 = vector.broadcast %cst_18 : f32 to vector<1x1xf32>
      %c0_19 = arith.constant 0 : index
      %c0_20 = arith.constant 0 : index
      %50 = vector.load %arg4[%c0_19, %c0_20] : memref<1x1xf32, #tpu.memory_space<vmem>>, vector<1x1xf32>
      tpu.vector_store %arg4[%c0_19, %c0_20], %49 {strides = array<i32>} : memref<1x1xf32, #tpu.memory_space<vmem>>, vector<1x1xf32>,
    } else {
    }
    %c0 = arith.constant 0 : index
    %c0_2 = arith.constant 0 : index
    %c0_3 = arith.constant 0 : index
    %5 = vector.load %arg2[%c0, %c0_2, %c0_3] : memref<1x128x128xf32, #tpu.memory_space<vmem>>, vector<1x128x128xf32>
    %6 = vector.shape_cast %5 : vector<1x128x128xf32> to vector<128x128xf32>
    %c0_4 = arith.constant 0 : index
    %c0_5 = arith.constant 0 : index
    %7 = vector.load %arg3[%c0_4, %c0_5] : memref<128x1xi32, #tpu.memory_space<vmem>>, vector<128x1xi32>
    %8 = tpu.iota {dimensions = array<i32: 1>} : vector<128x128xi32>
    %c16_i32 = arith.constant 16 : i32
    %9 = vector.broadcast %c16_i32 : i32 to vector<128x128xi32>
    %10 = arith.cmpi slt, %8, %9 : vector<128x128xi32>
    %cst = arith.constant -3.000000e+38 : f32
    %11 = vector.broadcast %cst : f32 to vector<128x128xf32>
    %12 = arith.select %10, %6, %11 : vector<128x128xi1>, vector<128x128xf32>
    %cst_6 = arith.constant dense<0xFF800000> : vector<128xf32>
    %13 = vector.multi_reduction <maximumf>, %12, %cst_6 [1] : vector<128x128xf32> to vector<128xf32>
    %14 = vector.shape_cast %13 : vector<128xf32> to vector<128x1xf32>
    %15 = vector.broadcast %14 : vector<128x1xf32> to vector<128x128xf32>
    %16 = arith.subf %12, %15 : vector<128x128xf32>
    %17 = math.exp %16 : vector<128x128xf32>
    %cst_7 = arith.constant dense<0.000000e+00> : vector<128xf32>
    %18 = vector.multi_reduction <add>, %17, %cst_7 [1] : vector<128x128xf32> to vector<128xf32>
    %19 = vector.shape_cast %18 : vector<128xf32> to vector<128x1xf32>
    %20 = math.log %19 : vector<128x1xf32>
    %21 = arith.addf %20, %14 : vector<128x1xf32>
    %22 = vector.broadcast %7 : vector<128x1xi32> to vector<128x128xi32>
    %23 = arith.cmpi eq, %8, %22 : vector<128x128xi32>
    %cst_8 = arith.constant 0.000000e+00 : f32
    %24 = vector.broadcast %cst_8 : f32 to vector<128x128xf32>
    %25 = arith.select %23, %12, %24 : vector<128x128xi1>, vector<128x128xf32>
    %cst_9 = arith.constant dense<0.000000e+00> : vector<128xf32>
    %26 = vector.multi_reduction <add>, %25, %cst_9 [1] : vector<128x128xf32> to vector<128xf32>
    %27 = vector.shape_cast %26 : vector<128xf32> to vector<128x1xf32>
    %c128_i32 = arith.constant 128 : i32
    %28 = arith.muli %arg1, %c128_i32 : i32
    %29 = tpu.iota {dimensions = array<i32: 0>} : vector<128x1xi32>
    %30 = vector.broadcast %28 : i32 to vector<128x1xi32>
    %31 = arith.addi %30, %29 : vector<128x1xi32>
    %c8_i32 = arith.constant 8 : i32
    %32 = vector.broadcast %c8_i32 : i32 to vector<128x1xi32>
    %33 = arith.cmpi slt, %31, %32 : vector<128x1xi32>
    %cst_10 = arith.constant 1.000000e+00 : f32
    %cst_11 = arith.constant 0.000000e+00 : f32
    %34 = vector.broadcast %cst_10 : f32 to vector<128x1xf32>
    %35 = vector.broadcast %cst_11 : f32 to vector<128x1xf32>
    %36 = arith.select %33, %34, %35 : vector<128x1xi1>, vector<128x1xf32>
    %c0_12 = arith.constant 0 : index
    %c0_13 = arith.constant 0 : index
    %37 = vector.load %arg4[%c0_12, %c0_13] : memref<1x1xf32, #tpu.memory_space<vmem>>, vector<1x1xf32>
    %38 = arith.subf %21, %27 : vector<128x1xf32>
    %39 = arith.mulf %38, %36 : vector<128x1xf32>
    %40 = vector.shape_cast %39 : vector<128x1xf32> to vector<1x128x1xf32>
    %cst_14 = arith.constant dense<0.000000e+00> : vector<1xf32>
    %41 = vector.multi_reduction <add>, %40, %cst_14 [1, 2] : vector<1x128x1xf32> to vector<1xf32>
    %42 = vector.shape_cast %41 : vector<1xf32> to vector<1x1x1xf32>
    %43 = vector.extract %42[0, 0, 0] : f32 from vector<1x1x1xf32>
    %44 = vector.broadcast %43 : f32 to vector<1x1xf32>
    %cst_15 = arith.constant 1.250000e-01 : f32
    %45 = vector.broadcast %cst_15 : f32 to vector<1x1xf32>
    %46 = arith.mulf %44, %45 : vector<1x1xf32>
    %47 = arith.addf %37, %46 : vector<1x1xf32>
    %c0_16 = arith.constant 0 : index
    %c0_17 = arith.constant 0 : index
    %48 = vector.load %arg4[%c0_16, %c0_17] : memref<1x1xf32, #tpu.memory_space<vmem>>, vector<1x1xf32>
    tpu.vector_store %arg4[%c0_16, %c0_17], %47 {strides = array<i32>} : memref<1x1xf32, #tpu.memory_space<vmem>>, vector<1x1xf32>,
    return
  }
  func.func @transform_0(%arg0: i32, %arg1: i32) -> (i32, i32, i32) {
    %c0_i32 = arith.constant 0 : i32
    %c0_i32_0 = arith.constant 0 : i32
    return %arg0, %arg1, %c0_i32 : i32, i32, i32
  }
  func.func @transform_1(%arg0: i32, %arg1: i32) -> (i32, i32) {
    %c0_i32 = arith.constant 0 : i32
    %c0_i32_0 = arith.constant 0 : i32
    return %arg1, %c0_i32 : i32, i32
  }
  func.func @transform_2(%arg0: i32, %arg1: i32) -> (i32, i32) {
    %c0_i32 = arith.constant 0 : i32
    %c0_i32_0 = arith.constant 0 : i32
    %c0_i32_1 = arith.constant 0 : i32
    return %c0_i32, %c0_i32_0 : i32, i32
  }
}

</mosaic_0001>

<bundles_post_ra>
// kernel: tpu_custom_call.1
= control target key start
LH: loop header
LB: loop body
LE: loop exit
PB: predicated region body
PF: predicated region fallthrough
CT: control target
= control target key end

     0   :  { %7 = vsyncpa [#allocation3], 0  ;;  %s1407_s0 = inlined_call_operand.hbm [shape: f32[2,128,128], index: 0, kind: input, shape index: {}]   ;;  %s1408_s1 = inlined_call_operand.vmem [shape: s32[128,1], index: 1, kind: input, shape index: {}]   ;;  %s1409_s2 = inlined_call_operand.hbm [shape: f32[1,1], index: 2, kind: output, shape index: {}]  }
   0x1   :  { %9 = vsyncpa [#allocation3 + $0x1], 0 }
   0x2   :  { %10 = vsyncpa [#allocation4], 0  ;;  %s1039_s9 = smov 0   ;;  %s1041_s10 = smov 0  }
   0x3   :  { %s1043_s11 = smov 0   ;;  %s1045_s12 = smov 0  }
   0x4   :  { %s1047_s13 = smov 0   ;;  %s1049_s14 = smov 0  }
   0x5 LB: > { %s754_s15 = sadd.s32 4294967295, %s1017_s14   ;;  %s28_s16 = sadd.s32 1, %s1013_s13  ;;  %s1017_s14 = sphi %s1049_s14, %s16_s14   ;;  %s1013_s13 = sphi %s1047_s13, %s1416_s13   ;;  %s1009_s12 = sphi %s1045_s12, %s1415_s12   ;;  %s1005_s11 = sphi %s1043_s11, %s1414_s11   ;;  %s1001_s10 = sphi %s1041_s10, %s1413_s10   ;;  %s997_s9 = sphi %s1039_s9, %s1412_s9  }
   0x6   : > { %p30_p0 = scmp.ge.s32.totalorder %s28_s16, 2  ;;  %s37_s17 = sadd.s32 1, %s1005_s11 }
   0x7   : > { %p44_p1 = scmp.ne.s32.totalorder %s1005_s11, %s1001_s10  ;;  %p45_p2 = scmp.eq.s32.totalorder %s1017_s14, 0 }
   0x8   : > { %s1418_s16 = smov (%p30_p0, %s28_s16), 0  ;;  %p50_p4 = scmp.ne.s32.totalorder %s1001_s10, %s997_s9 }
   0x9   : > { %p1075_p3 = por %p45_p2, %p44_p1  ;;  %s32_s19 = ssub.s32 %s1013_s13, %s1418_s16 }
   0xa   : > { %p51_p5 = scmp.eq.s32.totalorder %s754_s15, 0  ;;  %p35_p6 = scmp.eq.s32.totalorder %s32_s19, 0 }
   0xb   : > { %p782_p8 = scmp.lt.s32.totalorder %s1017_s14, 2  ;;  %s130_s22 = sand.u32 1, %s1005_s11  }
   0xc   : > { %p1084_p7 = por %p51_p5, %p50_p4  ;;  %s768_s23 = sshll.u32 %s1013_s13, 7 }
   0xd   : > { %s1090_s21 = scalar_select %p35_p6, %s1005_s11, %s37_s17  }
   0xe   : > { %s758_s24 = sshll.u32 %s130_s22, 7  ;;  %s141_s27 = scalar_lea.hbm %s1407_s0, %s768_s23 }
   0xf   : > { %s142_s28 = sshll.u32 %s141_s27, 4  ;;  %s134_s29 = scalar_lea.vmem [#allocation2], %s758_s24  ;;  %s143_s28 = int_to_ptr.hbm [resolvable:$true] %s142_s28 }
  0x10   : > { %s144_s30 = sshll.u32 %s134_s29, 4  ;;  %p779_p9 = pnand %p782_p8, %p1075_p3  ;;  %s145_s30 = int_to_ptr.vmem [resolvable:$true] %s144_s30 }
  0x11   : > { %p761_p10 = scmp.ge.s32.totalorder %s1017_s14, 1  ;;  %p152_p11 = scmp.lt.s32.totalorder %s1017_s14, 3 }
  0x12   : > { %s131_s3 = scalar_lea.sflag [#allocation3], %s130_s22  ;;  %s1019_s4 = smov 128  }
  0x13   : > { %s1020_s5 = smov 8   ;;  %p153_p12 = pnand %p761_p10, %p152_p11 }
  0x14   : > { %781 = dma.hbm_to_vmem [thread:$0]  (!%p779_p9), %s143_s28, 2048, %s145_s30, %s131_s3, %s1019_s4, %s1019_s4, %s1020_s5  }
  0x15   : > { %156 = sbr.rel (%p153_p12) target bundleno = 588 (0x24c), region = 28  ;;  %s158_s6 = sand.u32 (!%p153_p12), 1, %s1001_s10  }
  0x16   : > { %s762_s7 = sshll.u32 (!%p153_p12), %s158_s6, 7  ;;  %s159_s8 = scalar_lea.sflag (!%p153_p12), [#allocation3], %s158_s6 }
  0x17   : > { %s1102_s9 = scalar_lea.vmem (!%p153_p12), [#allocation2], %s762_s7 }
  0x1a   : > { %988 = dma.done.wait (%p1084_p7), %s159_s8, 2048  }
  0x1b   : > { %990 = vsyncadd (%p1084_p7), %s159_s8, 4294965248  ;;  %p191_p13 = scmp.eq.s32.totalorder %s1009_s12, 0 }
  0x1c   : > { %vm197_vm0 = vcmask (%p191_p13), 0   ;;  %v1021_v0 = vmov (%p191_p13), 0.0  }
  0x1d   : > { %196 = sbr.rel (!%p191_p13) target bundleno = 34 (0x22), region = 36  ;;  %198 = vst.msk [vmem:[#allocation5] sm:$0x1] (%p191_p13), %vm197_vm0, %v1021_v0 }
  0x22 PF: > { %v231_v1 = vlaneseq  ;;  %v203_v2 = vld [vmem:[%s1102_s9 + $0x20] sm:$0xff]  ;;  %v201_v4 = vld [vmem:[%s1102_s9 + $0x10] sm:$0xff]  ;;  %v204_v9 = vld [vmem:[%s1102_s9 + $0x28] sm:$0xff]  ;;  %v1022_v17 = vmov 0   ;;  %s1023_s29 = smov [#allocation5]   ;;  %s676_s5 = sshll.u32 %s1409_s2, 4  ;;  %s677_s5 = int_to_ptr.hbm [resolvable:$true] %s676_s5 }
  0x23   : > { %v199_v5 = vld [vmem:[%s1102_s9] sm:$0xff]  ;;  %v202_v10 = vld [vmem:[%s1102_s9 + $0x18] sm:$0xff]  ;;  %v200_v11 = vld [vmem:[%s1102_s9 + $0x8] sm:$0xff]  ;;  %838 = vset.pattern.permute.xlu2 %v1022_v17  ;;  %839 = vset.pattern.permute.xlu1 %v1022_v17  ;;  %s674_s30 = sshll.u32 %s1023_s29, 4  ;;  %p783_p0 = scmp.eq.s32.totalorder %s754_s15, 1  ;;  %s675_s30 = int_to_ptr.vmem [resolvable:$true] %s674_s30 }
  0x24   : > { %v1110_v3 = vand.u32 127, %v231_v1  ;;  %v207_v15 = vld [vmem:[%s1102_s9 + $0x40] sm:$0xff]  ;;  %v206_v16 = vld [vmem:[%s1102_s9 + $0x38] sm:$0xff]  ;;  %v205_v18 = vld [vmem:[%s1102_s9 + $0x30] sm:$0xff]  ;;  %840 = vset.pattern.permute.xlu0 %v1022_v17 }
  0x25   : > { %v210_v22 = vld [vmem:[%s1102_s9 + $0x58] sm:$0xff]  ;;  %v209_v23 = vld [vmem:[%s1102_s9 + $0x50] sm:$0xff]  ;;  %v208_v24 = vld [vmem:[%s1102_s9 + $0x48] sm:$0xff] }
  0x26   : > { %vm233_vm1 = vcmp.lt.s32.totalorder %v1110_v3, 16  ;;  %v212_v28 = vld [vmem:[%s1102_s9 + $0x68] sm:$0xff]  ;;  %v213_v29 = vld [vmem:[%s1102_s9 + $0x70] sm:$0xff]  ;;  %v211_v30 = vld [vmem:[%s1102_s9 + $0x60] sm:$0xff] }
  0x27   : > { %v1117_v6 = vsel %vm233_vm1, %v203_v2, -3e+38  ;;  %v1121_v7 = vsel %vm233_vm1, %v201_v4, -3e+38  ;;  %v1125_v8 = vsel %vm233_vm1, %v199_v5, -3e+38 }
  0x28   : > { %258 = vmax.xlane.f32.xlu2 %v1117_v6  ;;  %254 = vmax.xlane.f32.xlu1 %v1121_v7  ;;  %v1135_v12 = vsel %vm233_vm1, %v204_v9, -3e+38  ;;  %v1139_v13 = vsel %vm233_vm1, %v202_v10, -3e+38  ;;  %v1143_v14 = vsel %vm233_vm1, %v200_v11, -3e+38 }
  0x29   : > { %250 = vmax.xlane.f32.xlu0 %v1125_v8  ;;  %v1153_v19 = vsel %vm233_vm1, %v207_v15, -3e+38  ;;  %v1157_v20 = vsel %vm233_vm1, %v206_v16, -3e+38  ;;  %v1161_v21 = vsel %vm233_vm1, %v205_v18, -3e+38 }
  0x2a   : > { %v1171_v25 = vsel %vm233_vm1, %v210_v22, -3e+38  ;;  %v1175_v26 = vsel %vm233_vm1, %v209_v23, -3e+38  ;;  %v1179_v27 = vsel %vm233_vm1, %v208_v24, -3e+38 }
  0x2b   : > { %v1189_v31 = vsel %vm233_vm1, %v212_v28, -3e+38  ;;  %v1193_v32 = vsel %vm233_vm1, %v213_v29, -3e+38  ;;  %v1197_v33 = vsel %vm233_vm1, %v211_v30, -3e+38 }
  0x2c   : > { %v214_v34 = vld [vmem:[%s1102_s9 + $0x78] sm:$0xff]  ;;  %v215_v36 = vld [vmem:[%s1408_s1] sm:$0xff]  ;;  %v216_v37 = vld [vmem:[%s1408_s1 + $0x8] sm:$0xff] }
  0x2d   : > { %v1205_v35 = vsel %vm233_vm1, %v214_v34, -3e+38  ;;  %v217_v38 = vld [vmem:[%s1408_s1 + $0x10] sm:$0xff]  ;;  %v220_v39 = vld [vmem:[%s1408_s1 + $0x28] sm:$0xff]  ;;  %v218_v40 = vld [vmem:[%s1408_s1 + $0x18] sm:$0xff] }
  0x2e   : > { %v219_v41 = vld [vmem:[%s1408_s1 + $0x20] sm:$0xff]  ;;  %v222_v42 = vld [vmem:[%s1408_s1 + $0x38] sm:$0xff]  ;;  %v221_v43 = vld [vmem:[%s1408_s1 + $0x30] sm:$0xff] }
  0x2f   : > { %v224_v44 = vld [vmem:[%s1408_s1 + $0x48] sm:$0xff]  ;;  %v223_v45 = vld [vmem:[%s1408_s1 + $0x40] sm:$0xff]  ;;  %v225_v46 = vld [vmem:[%s1408_s1 + $0x50] sm:$0xff] }
  0x30   : > { %260 = vmax.xlane.f32.xlu2 %v1135_v12  ;;  %256 = vmax.xlane.f32.xlu1 %v1139_v13  ;;  %v230_v47 = vld [vmem:[%s1408_s1 + $0x78] sm:$0xff]  ;;  %v227_v49 = vld [vmem:[%s1408_s1 + $0x60] sm:$0xff]  ;;  %v228_v50 = vld [vmem:[%s1408_s1 + $0x68] sm:$0xff] }
  0x31   : > { %252 = vmax.xlane.f32.xlu0 %v1143_v14  ;;  %v226_v48 = vld [vmem:[%s1408_s1 + $0x58] sm:$0xff]  ;;  %v229_v51 = vld [vmem:[%s1408_s1 + $0x70] sm:$0xff] }
  0x38   : > { %266 = vmax.xlane.f32.xlu2 %v1153_v19  ;;  %264 = vmax.xlane.f32.xlu1 %v1157_v20 }
  0x39   : > { %262 = vmax.xlane.f32.xlu0 %v1161_v21 }
  0x40   : > { %272 = vmax.xlane.f32.xlu2 %v1171_v25  ;;  %270 = vmax.xlane.f32.xlu1 %v1175_v26 }
  0x41   : > { %268 = vmax.xlane.f32.xlu0 %v1179_v27 }
  0x48   : > { %276 = vmax.xlane.f32.xlu2 %v1189_v31  ;;  %278 = vmax.xlane.f32.xlu1 %v1193_v32 }
  0x49   : > { %274 = vmax.xlane.f32.xlu0 %v1197_v33 }
  0x51   : > { %280 = vmax.xlane.f32.xlu0 %v1205_v35 }
  0x60   : > { %411 = vperm.xlu2 %838, %v215_v36  }
  0x61   : > { %414 = vperm.xlu1 %839, %v216_v37  }
  0x65   : > { %417 = vperm.xlu0 %840, %v217_v38  }
  0x68   : > { %426 = vperm.xlu2 %838, %v220_v39  }
  0x69   : > { %420 = vperm.xlu1 %839, %v218_v40  }
  0x6d   : > { %423 = vperm.xlu0 %840, %v219_v41  }
  0x70   : > { %432 = vperm.xlu2 %838, %v222_v42  }
  0x71   : > { %429 = vperm.xlu1 %839, %v221_v43  }
  0x75   : > { %438 = vperm.xlu0 %840, %v224_v44  }
  0x78   : > { %435 = vperm.xlu2 %838, %v223_v45  }
  0x79   : > { %441 = vperm.xlu1 %839, %v225_v46  }
  0x7d   : > { %456 = vperm.xlu0 %840, %v230_v47  }
  0x80   : > { %444 = vperm.xlu2 %838, %v226_v48  }
  0x81   : > { %447 = vperm.xlu1 %839, %v227_v49  }
  0x88   : > { %450 = vperm.xlu2 %838, %v228_v50  }
  0x89   : > { %453 = vperm.xlu1 %839, %v229_v51  }
  0x9b   : > { %v1256_v52 = vpop.xlane.xlu2 %258  ;;  %v1258_v53 = vpop.xlane.xlu1 %254 }
  0x9c   : > { %v284_v54 = vsub.f32 %v1121_v7, %v1258_v53  ;;  %v1262_v55 = vpop.xlane.xlu0 %250  ;;  %v286_v2 = vsub.f32 %v1117_v6, %v1256_v52 }
  0x9d   : > { %v282_v59 = vsub.f32 %v1125_v8, %v1262_v55 }
  0x9e   : > { %v302_v56 = vmul.f32 1.442695, %v284_v54  ;;  %v306_v11 = vmul.f32 1.442695, %v286_v2 }
  0x9f   : > { %v298_v4 = vmul.f32 1.442695, %v282_v59 }
  0xa0   : > { %841 = vpow2.f32 %v302_v56 }
  0xa3   : > { %v1264_v57 = vpop.xlane.xlu2 %260  ;;  %v1266_v58 = vpop.xlane.xlu1 %256 }
  0xa4   : > { %v287_v60 = vsub.f32 %v1135_v12, %v1264_v57  ;;  %v1272_v61 = vpop.xlane.xlu0 %252  ;;  %v285_v5 = vsub.f32 %v1139_v13, %v1266_v58 }
  0xa5   : > { %v283_v62 = vsub.f32 %v1143_v14, %v1272_v61 }
  0xa6   : > { %v308_v63 = vmul.f32 1.442695, %v287_v60  ;;  %v842_v0 = vpop.eup %841  ;;  %v304_v17 = vmul.f32 1.442695, %v285_v5 }
  0xa7   : > { %v300_v1 = vmul.f32 1.442695, %v283_v62  ;;  %334 = vadd.xlane.f32.xlu0 %v842_v0 }
  0xa8   : > { %843 = vpow2.f32 %v308_v63 }
  0xa9   : > { %845 = vpow2.f32 %v300_v1 }
  0xaa   : > { %847 = vpow2.f32 %v298_v4 }
  0xab   : > { %v1280_v9 = vpop.xlane.xlu2 %266  ;;  %v1282_v10 = vpop.xlane.xlu1 %264  ;;  %849 = vpow2.f32 %v306_v11 }
  0xac   : > { %v289_v15 = vsub.f32 %v1157_v20, %v1282_v10  ;;  %v290_v22 = vsub.f32 %v1153_v19, %v1280_v9  ;;  %v1288_v23 = vpop.xlane.xlu0 %262 }
  0xad   : > { %v288_v29 = vsub.f32 %v1161_v21, %v1288_v23 }
  0xae   : > { %v844_v16 = vpop.eup %843  ;;  %v312_v18 = vmul.f32 1.442695, %v289_v15  ;;  %v314_v30 = vmul.f32 1.442695, %v290_v22 }
  0xaf   : > { %v846_v24 = vpop.eup %845  ;;  %340 = vadd.xlane.f32.xlu0 %v844_v16  ;;  %v310_v37 = vmul.f32 1.442695, %v288_v29 }
  0xb0   : > { %851 = vpow2.f32 %v312_v18  ;;  %v848_v28 = vpop.eup %847 }
  0xb1   : > { %332 = vadd.xlane.f32.xlu2 %v846_v24  ;;  %853 = vpow2.f32 %v304_v17  ;;  %v850_v36 = vpop.eup %849 }
  0xb2   : > { %855 = vpow2.f32 %v314_v30 }
  0xb3   : > { %v1292_v34 = vpop.xlane.xlu2 %272  ;;  %330 = vadd.xlane.f32.xlu1 %v848_v28  ;;  %857 = vpow2.f32 %v310_v37  ;;  %v1298_v44 = vpop.xlane.xlu1 %270 }
  0xb4   : > { %v1294_v40 = vpop.xlane.xlu0 %268  ;;  %v292_v54 = vsub.f32 %v1175_v26, %v1298_v44  ;;  %v293_v60 = vsub.f32 %v1171_v25, %v1292_v34 }
  0xb5   : > { %v291_v56 = vsub.f32 %v1179_v27, %v1294_v40 }
  0xb6   : > { %v852_v38 = vpop.eup %851  ;;  %v320_v2 = vmul.f32 1.442695, %v293_v60 }
  0xb7   : > { %v854_v39 = vpop.eup %853  ;;  %344 = vadd.xlane.f32.xlu0 %v852_v38  ;;  %v316_v62 = vmul.f32 1.442695, %v291_v56 }
  0xb8   : > { %v856_v42 = vpop.eup %855 }
  0xb9   : > { %336 = vadd.xlane.f32.xlu2 %v854_v39  ;;  %v858_v43 = vpop.eup %857 }
  0xbb   : > { %v1296_v41 = vpop.xlane.xlu2 %276  ;;  %338 = vadd.xlane.f32.xlu1 %v850_v36  ;;  %v1304_v48 = vpop.xlane.xlu1 %278 }
  0xbc   : > { %v1301_v46 = vpop.xlane.xlu0 %274 }
  0xbf   : > { %346 = vadd.xlane.f32.xlu0 %v856_v42 }
  0xc1   : > { %342 = vadd.xlane.f32.xlu2 %v858_v43 }
  0xc3   : > { %v412_v45 = vpop.permute.xlu2 %411 }
  0xc4   : > { %vm458_vm2 = vcmp.eq.s32.totalorder %v1110_v3, %v412_v45  ;;  %v1306_v49 = vpop.xlane.xlu0 %280 }
  0xc5   : > { %v474_v47 = vsel %vm458_vm2, %v1125_v8, 0.0  ;;  %v318_v8 = vmul.f32 1.442695, %v292_v54  ;;  %vm622_vm2 = vcmask 7168  }
  0xc7   : > { %859 = vpow2.f32 %v318_v8 }
  0xc8   : > { %861 = vpow2.f32 %v316_v62 }
  0xc9   : > { %490 = vadd.xlane.f32.xlu2 %v474_v47  ;;  %863 = vpow2.f32 %v320_v2 }
  0xcb   : > { %v427_v63 = vpop.permute.xlu2 %426 }
  0xcc   : > { %vm463_vm7 = vcmp.eq.s32.totalorder %v1110_v3, %v427_v63 }
  0xcd   : > { %v860_v11 = vpop.eup %859  ;;  %v479_v28 = vsel %vm463_vm7, %v1135_v12, 0.0  ;;  %v297_v12 = vsub.f32 %v1205_v35, %v1306_v49 }
  0xce   : > { %v862_v15 = vpop.eup %861 }
  0xcf   : > { %v864_v18 = vpop.eup %863  ;;  %v328_v47 = vmul.f32 1.442695, %v297_v12 }
  0xd3   : > { %v415_v50 = vpop.permute.xlu1 %414  ;;  %v433_v16 = vpop.permute.xlu2 %432 }
  0xd4   : > { %vm459_vm3 = vcmp.eq.s32.totalorder %v1110_v3, %v415_v50  ;;  %vm465_vm9 = vcmp.eq.s32.totalorder %v1110_v3, %v433_v16 }
  0xd5   : > { %v475_v51 = vsel %vm459_vm3, %v1143_v14, 0.0  ;;  %v481_v37 = vsel %vm465_vm9, %v1157_v20, 0.0  ;;  %vm666_vm3 = vcmask 0  }
  0xd6   : > { %492 = vadd.xlane.f32.xlu1 %v475_v51 }
  0xd7   : > { %v418_v59 = vpop.permute.xlu0 %417 }
  0xd8   : > { %vm460_vm4 = vcmp.eq.s32.totalorder %v1110_v3, %v418_v59 }
  0xd9   : > { %v476_v1 = vsel %vm460_vm4, %v1121_v7, 0.0  ;;  %v295_v7 = vsub.f32 %v1189_v31, %v1296_v41 }
  0xdb   : > { %v421_v0 = vpop.permute.xlu1 %420  ;;  %v324_v22 = vmul.f32 1.442695, %v295_v7  ;;  %v436_v36 = vpop.permute.xlu2 %435 }
  0xdc   : > { %vm461_vm5 = vcmp.eq.s32.totalorder %v1110_v3, %v421_v0  ;;  %vm466_vm10 = vcmp.eq.s32.totalorder %v1110_v3, %v436_v36 }
  0xdd   : > { %v477_v14 = vsel %vm461_vm5, %v1139_v13, 0.0  ;;  %v294_v13 = vsub.f32 %v1197_v33, %v1301_v46  ;;  %865 = vpow2.f32 %v324_v22  ;;  %v482_v50 = vsel %vm466_vm10, %v1153_v19, 0.0 }
  0xde   : > { %494 = vadd.xlane.f32.xlu1 %v476_v1  ;;  %496 = vadd.xlane.f32.xlu2 %v477_v14 }
  0xdf   : > { %v424_v4 = vpop.permute.xlu0 %423  ;;  %v322_v24 = vmul.f32 1.442695, %v294_v13 }
  0xe0   : > { %vm462_vm6 = vcmp.eq.s32.totalorder %v1110_v3, %v424_v4 }
  0xe1   : > { %v478_v5 = vsel %vm462_vm6, %v1117_v6, 0.0  ;;  %v296_v6 = vsub.f32 %v1193_v32, %v1304_v48  ;;  %867 = vpow2.f32 %v322_v24 }
  0xe2   : > { %498 = vadd.xlane.f32.xlu0 %v478_v5 }
  0xe3   : > { %v430_v17 = vpop.permute.xlu1 %429  ;;  %v326_v30 = vmul.f32 1.442695, %v296_v6  ;;  %v866_v39 = vpop.eup %865 }
  0xe4   : > { %vm464_vm8 = vcmp.eq.s32.totalorder %v1110_v3, %v430_v17  ;;  %v445_v45 = vpop.permute.xlu2 %444 }
  0xe5   : > { %v480_v29 = vsel %vm464_vm8, %v1161_v21, 0.0  ;;  %869 = vpow2.f32 %v326_v30  ;;  %vm469_vm13 = vcmp.eq.s32.totalorder %v1110_v3, %v445_v45 }
  0xe6   : > { %348 = vadd.xlane.f32.xlu1 %v862_v15  ;;  %350 = vadd.xlane.f32.xlu2 %v860_v11  ;;  %871 = vpow2.f32 %v328_v47  ;;  %v485_v8 = vsel %vm469_vm13, %v1171_v25, 0.0 }
  0xe7   : > { %v868_v42 = vpop.eup %867  ;;  %v439_v21 = vpop.permute.xlu0 %438 }
  0xe8   : > { %vm467_vm11 = vcmp.eq.s32.totalorder %v1110_v3, %v439_v21 }
  0xe9   : > { %v483_v51 = vsel %vm467_vm11, %v1179_v27, 0.0 }
  0xea   : > { %352 = vadd.xlane.f32.xlu0 %v864_v18 }
  0xeb   : > { %v442_v38 = vpop.permute.xlu1 %441  ;;  %v870_v43 = vpop.eup %869 }
  0xec   : > { %vm468_vm12 = vcmp.eq.s32.totalorder %v1110_v3, %v442_v38  ;;  %v451_v56 = vpop.permute.xlu2 %450  ;;  %v872_v59 = vpop.eup %871 }
  0xed   : > { %v484_v54 = vsel %vm468_vm12, %v1175_v26, 0.0  ;;  %vm471_vm14 = vcmp.eq.s32.totalorder %v1110_v3, %v451_v56 }
  0xee   : > { %500 = vadd.xlane.f32.xlu1 %v479_v28  ;;  %502 = vadd.xlane.f32.xlu2 %v480_v29  ;;  %v487_v27 = vsel %vm471_vm14, %v1189_v31, 0.0 }
  0xef   : > { %v457_v62 = vpop.permute.xlu0 %456 }
  0xf0   : > { %vm473_vm1 = vcmp.eq.s32.totalorder %v1110_v3, %v457_v62 }
  0xf1   : > { %v489_v25 = vsel %vm473_vm1, %v1205_v35, 0.0 }
  0xf2   : > { %504 = vadd.xlane.f32.xlu0 %v481_v37 }
  0xf3   : > { %v448_v20 = vpop.permute.xlu1 %447 }
  0xf4   : > { %vm470_vm15 = vcmp.eq.s32.totalorder %v1110_v3, %v448_v20 }
  0xf5   : > { %v486_v26 = vsel %vm470_vm15, %v1197_v33, 0.0 }
  0xf6   : > { %354 = vadd.xlane.f32.xlu1 %v868_v42  ;;  %356 = vadd.xlane.f32.xlu2 %v866_v39 }
  0xfa   : > { %358 = vadd.xlane.f32.xlu0 %v870_v43 }
  0xfb   : > { %v454_v19 = vpop.permute.xlu1 %453 }
  0xfc   : > { %vm472_vm0 = vcmp.eq.s32.totalorder %v1110_v3, %v454_v19 }
  0xfd   : > { %v488_v60 = vsel %vm472_vm0, %v1193_v32, 0.0 }
  0xfe   : > { %506 = vadd.xlane.f32.xlu1 %v482_v50  ;;  %508 = vadd.xlane.f32.xlu2 %v483_v51 }
 0x102   : > { %510 = vadd.xlane.f32.xlu0 %v484_v54 }
 0x106   : > { %360 = vadd.xlane.f32.xlu1 %v872_v59  ;;  %512 = vadd.xlane.f32.xlu2 %v485_v8 }
 0x10a   : > { %516 = vadd.xlane.f32.xlu0 %v487_v27 }
 0x10e   : > { %514 = vadd.xlane.f32.xlu1 %v486_v26  ;;  %518 = vadd.xlane.f32.xlu2 %v488_v60 }
 0x116   : > { %520 = vadd.xlane.f32.xlu1 %v489_v25 }
 0x11a   : > { %v335_v0 = vpop.xlane.xlu0 %334 }
 0x122   : > { %v341_v14 = vpop.xlane.xlu0 %340 }
 0x124   : > { %v333_v63 = vpop.xlane.xlu2 %332 }
 0x125   : > { %873 = vlog2.f32 %v333_v63 }
 0x126   : > { %v331_v1 = vpop.xlane.xlu1 %330  ;;  %875 = vlog2.f32 %v335_v0 }
 0x127   : > { %877 = vlog2.f32 %v331_v1 }
 0x12a   : > { %v345_v5 = vpop.xlane.xlu0 %344 }
 0x12b   : > { %v874_v15 = vpop.eup %873 }
 0x12c   : > { %v337_v31 = vpop.xlane.xlu2 %336  ;;  %v876_v7 = vpop.eup %875  ;;  %v365_v35 = vmul.f32 0.6931472, %v874_v15 }
 0x12d   : > { %879 = vlog2.f32 %v337_v31  ;;  %v367_v17 = vmul.f32 0.6931472, %v876_v7  ;;  %v878_v18 = vpop.eup %877 }
 0x12e   : > { %v339_v4 = vpop.xlane.xlu1 %338  ;;  %v395_v22 = vadd.f32 %v365_v35, %v1272_v61  ;;  %v363_v29 = vmul.f32 0.6931472, %v878_v18 }
 0x12f   : > { %881 = vlog2.f32 %v339_v4  ;;  %v396_v36 = vadd.f32 %v367_v17, %v1258_v53 }
 0x130   : > { %883 = vlog2.f32 %v341_v14  ;;  %v394_v43 = vadd.f32 %v363_v29, %v1262_v55 }
 0x132   : > { %v347_v32 = vpop.xlane.xlu0 %346 }
 0x133   : > { %v880_v6 = vpop.eup %879 }
 0x134   : > { %v343_v2 = vpop.xlane.xlu2 %342  ;;  %v369_v38 = vmul.f32 0.6931472, %v880_v6 }
 0x135   : > { %v882_v37 = vpop.eup %881  ;;  %885 = vlog2.f32 %v343_v2 }
 0x136   : > { %v884_v42 = vpop.eup %883  ;;  %v371_v21 = vmul.f32 0.6931472, %v882_v37  ;;  %887 = vlog2.f32 %v345_v5  ;;  %v397_v50 = vadd.f32 %v369_v38, %v1266_v58 }
 0x137   : > { %v373_v47 = vmul.f32 0.6931472, %v884_v42  ;;  %889 = vlog2.f32 %v347_v32 }
 0x138   : > { %v398_v59 = vadd.f32 %v371_v21, %v1256_v52 }
 0x139   : > { %v399_v26 = vadd.f32 %v373_v47, %v1264_v57 }
 0x13b   : > { %v886_v8 = vpop.eup %885 }
 0x13c   : > { %v491_v11 = vpop.xlane.xlu2 %490  ;;  %v888_v60 = vpop.eup %887  ;;  %v375_v25 = vmul.f32 0.6931472, %v886_v8 }
 0x13d   : > { %v590_v61 = vsub.f32 %v394_v43, %v491_v11  ;;  %v377_v1 = vmul.f32 0.6931472, %v888_v60  ;;  %v890_v52 = vpop.eup %889 }
 0x13e   : > { %v379_v32 = vmul.f32 0.6931472, %v890_v52 }
 0x13f   : > { %v623_v19 = vsel %vm622_vm2, %v590_v61, 0.0 }
 0x149   : > { %v493_v33 = vpop.xlane.xlu1 %492 }
 0x14a   : > { %v591_v30 = vsub.f32 %v395_v22, %v493_v33  ;;  %v400_v33 = vadd.f32 %v375_v25, %v1288_v23 }
 0x14c   : > { %v607_v45 = vmul.f32 0.0, %v591_v30 }
 0x14e   : > { %v624_v53 = vsel %vm622_vm2, %v607_v45, 0.0 }
 0x14f   : > { %v625_v62 = vadd.f32 %v624_v53, %v623_v19 }
 0x151   : > { %v495_v16 = vpop.xlane.xlu1 %494  ;;  %v497_v3 = vpop.xlane.xlu2 %496 }
 0x152   : > { %v592_v39 = vsub.f32 %v396_v36, %v495_v16  ;;  %v593_v56 = vsub.f32 %v397_v50, %v497_v3  ;;  %v401_v3 = vadd.f32 %v377_v1, %v1282_v10 }
 0x154   : > { %v608_v20 = vmul.f32 0.0, %v592_v39  ;;  %v609_v63 = vmul.f32 0.0, %v593_v56 }
 0x155   : > { %v499_v13 = vpop.xlane.xlu0 %498 }
 0x156   : > { %v626_v55 = vsel %vm622_vm2, %v608_v20, 0.0  ;;  %v594_v27 = vsub.f32 %v398_v59, %v499_v13  ;;  %v628_v5 = vsel %vm622_vm2, %v609_v63, 0.0 }
 0x157   : > { %v627_v31 = vadd.f32 %v626_v55, %v625_v62 }
 0x158   : > { %v610_v14 = vmul.f32 0.0, %v594_v27 }
 0x159   : > { %v349_v24 = vpop.xlane.xlu1 %348  ;;  %v351_v28 = vpop.xlane.xlu2 %350  ;;  %v629_v57 = vadd.f32 %v628_v5, %v627_v31 }
 0x15a   : > { %891 = vlog2.f32 %v349_v24  ;;  %v630_v15 = vsel %vm622_vm2, %v610_v14, 0.0 }
 0x15b   : > { %893 = vlog2.f32 %v351_v28  ;;  %v631_v22 = vadd.f32 %v630_v15, %v629_v57  ;;  %v402_v28 = vadd.f32 %v379_v32, %v1280_v9 }
 0x15d   : > { %v353_v12 = vpop.xlane.xlu0 %352 }
 0x15e   : > { %895 = vlog2.f32 %v353_v12 }
 0x160   : > { %v892_v7 = vpop.eup %891 }
 0x161   : > { %v501_v51 = vpop.xlane.xlu1 %500  ;;  %v503_v54 = vpop.xlane.xlu2 %502  ;;  %v381_v6 = vmul.f32 0.6931472, %v892_v7 }
 0x162   : > { %v595_v0 = vsub.f32 %v399_v26, %v501_v51  ;;  %v596_v16 = vsub.f32 %v400_v33, %v503_v54  ;;  %v894_v18 = vpop.eup %893 }
 0x163   : > { %v383_v37 = vmul.f32 0.6931472, %v894_v18  ;;  %v403_v21 = vadd.f32 %v381_v6, %v1294_v40 }
 0x164   : > { %v611_v11 = vmul.f32 0.0, %v595_v0  ;;  %v612_v24 = vmul.f32 0.0, %v596_v16  ;;  %v896_v23 = vpop.eup %895 }
 0x165   : > { %v505_v58 = vpop.xlane.xlu0 %504  ;;  %v385_v10 = vmul.f32 0.6931472, %v896_v23  ;;  %v404_v61 = vadd.f32 %v383_v37, %v1298_v44 }
 0x166   : > { %v632_v13 = vsel %vm622_vm2, %v611_v11, 0.0  ;;  %v597_v17 = vsub.f32 %v401_v3, %v505_v58  ;;  %v634_v42 = vsel %vm622_vm2, %v612_v24, 0.0 }
 0x167   : > { %v633_v29 = vadd.f32 %v632_v13, %v631_v22  ;;  %v405_v54 = vadd.f32 %v385_v10, %v1292_v34 }
 0x168   : > { %v613_v38 = vmul.f32 0.0, %v597_v17 }
 0x169   : > { %v355_v2 = vpop.xlane.xlu1 %354  ;;  %v357_v4 = vpop.xlane.xlu2 %356  ;;  %v635_v43 = vadd.f32 %v634_v42, %v633_v29 }
 0x16a   : > { %897 = vlog2.f32 %v357_v4  ;;  %v636_v9 = vsel %vm622_vm2, %v613_v38, 0.0 }
 0x16b   : > { %899 = vlog2.f32 %v355_v2  ;;  %v637_v56 = vadd.f32 %v636_v9, %v635_v43 }
 0x16d   : > { %v359_v35 = vpop.xlane.xlu0 %358 }
 0x16e   : > { %901 = vlog2.f32 %v359_v35 }
 0x170   : > { %v898_v20 = vpop.eup %897 }
 0x171   : > { %v507_v30 = vpop.xlane.xlu1 %506  ;;  %v509_v36 = vpop.xlane.xlu2 %508  ;;  %v389_v19 = vmul.f32 0.6931472, %v898_v20 }
 0x172   : > { %v598_v39 = vsub.f32 %v402_v28, %v507_v30  ;;  %v599_v47 = vsub.f32 %v403_v21, %v509_v36  ;;  %v900_v53 = vpop.eup %899 }
 0x173   : > { %v387_v60 = vmul.f32 0.6931472, %v900_v53  ;;  %v407_v0 = vadd.f32 %v389_v19, %v1296_v41 }
 0x174   : > { %v614_v12 = vmul.f32 0.0, %v598_v39  ;;  %v615_v40 = vmul.f32 0.0, %v599_v47  ;;  %v902_v27 = vpop.eup %901 }
 0x175   : > { %v511_v45 = vpop.xlane.xlu0 %510  ;;  %v391_v44 = vmul.f32 0.6931472, %v902_v27  ;;  %v406_v14 = vadd.f32 %v387_v60, %v1301_v46 }
 0x176   : > { %v638_v50 = vsel %vm622_vm2, %v614_v12, 0.0  ;;  %v600_v51 = vsub.f32 %v404_v61, %v511_v45  ;;  %v640_v25 = vsel %vm622_vm2, %v615_v40, 0.0 }
 0x177   : > { %v639_v26 = vadd.f32 %v638_v50, %v637_v56  ;;  %v408_v33 = vadd.f32 %v391_v44, %v1304_v48 }
 0x178   : > { %v616_v62 = vmul.f32 0.0, %v600_v51 }
 0x179   : > { %v361_v59 = vpop.xlane.xlu1 %360  ;;  %v513_v8 = vpop.xlane.xlu2 %512  ;;  %v641_v34 = vadd.f32 %v640_v25, %v639_v26 }
 0x17a   : > { %v601_v55 = vsub.f32 %v405_v54, %v513_v8  ;;  %903 = vlog2.f32 %v361_v59  ;;  %v642_v31 = vsel %vm622_vm2, %v616_v62, 0.0 }
 0x17b   : > { %v643_v57 = vadd.f32 %v642_v31, %v641_v34 }
 0x17c   : > { %v617_v63 = vmul.f32 0.0, %v601_v55 }
 0x17d   : > { %v517_v58 = vpop.xlane.xlu0 %516 }
 0x17e   : > { %v603_v1 = vsub.f32 %v407_v0, %v517_v58  ;;  %v644_v5 = vsel %vm622_vm2, %v617_v63, 0.0 }
 0x17f   : > { %v645_v41 = vadd.f32 %v644_v5, %v643_v57 }
 0x180   : > { %v904_v52 = vpop.eup %903  ;;  %v619_v15 = vmul.f32 0.0, %v603_v1 }
 0x181   : > { %v515_v2 = vpop.xlane.xlu1 %514  ;;  %v519_v4 = vpop.xlane.xlu2 %518  ;;  %v393_v32 = vmul.f32 0.6931472, %v904_v52 }
 0x182   : > { %v602_v11 = vsub.f32 %v406_v14, %v515_v2  ;;  %v604_v3 = vsub.f32 %v408_v33, %v519_v4  ;;  %v648_v13 = vsel %vm622_vm2, %v619_v15, 0.0 }
 0x183   : > { %v409_v17 = vadd.f32 %v393_v32, %v1306_v49  ;;  %v589_v49 = vld [vmem:[#allocation5] sm:$0x1] }
 0x184   : > { %v618_v16 = vmul.f32 0.0, %v602_v11  ;;  %v620_v46 = vmul.f32 0.0, %v604_v3 }
 0x186   : > { %v646_v7 = vsel %vm622_vm2, %v618_v16, 0.0  ;;  %v650_v24 = vsel %vm622_vm2, %v620_v46, 0.0 }
 0x187   : > { %v647_v35 = vadd.f32 %v646_v7, %v645_v41 }
 0x189   : > { %v521_v18 = vpop.xlane.xlu1 %520  ;;  %v649_v22 = vadd.f32 %v648_v13, %v647_v35 }
 0x18a   : > { %v605_v6 = vsub.f32 %v409_v17, %v521_v18 }
 0x18b   : > { %v651_v28 = vadd.f32 %v650_v24, %v649_v22 }
 0x18c   : > { %v621_v48 = vmul.f32 0.0, %v605_v6 }
 0x18e   : > { %v652_v23 = vsel %vm622_vm2, %v621_v48, 0.0 }
 0x18f   : > { %v653_v29 = vadd.f32 %v652_v23, %v651_v28 }
 0x191   : > { %654 = vadd.xlane.f32.xlu0 %v653_v29 }
 0x204   : > { %v655_v30 = vpop.xlane.xlu0 %654 }
 0x205   : > { %v656_v36 = vrot.slane %v655_v30, 4 }
 0x207   : > { %v657_v37 = vadd.f32 %v656_v36, %v655_v30 }
 0x209   : > { %v658_v38 = vrot.slane %v657_v37, 2 }
 0x20b   : > { %v659_v39 = vadd.f32 %v658_v38, %v657_v37 }
 0x20d   : > { %v660_v10 = vrot.slane %v659_v39, 1 }
 0x20f   : > { %v661_v42 = vadd.f32 %v660_v10, %v659_v39 }
 0x211   : > { %770 = vpush %v661_v42 }
 0x242   : > { %s771_s28 = spop %770 }
 0x243   : > { %v663_v12 = vstv %s771_s28 }
 0x244   : > { %v664_v21 = vmul.f32 0.125, %v663_v12 }
 0x246   : > { %v665_v43 = vadd.f32 %v664_v21, %v589_v49 }
 0x248   : > { %667 = vst.msk [vmem:[#allocation5] sm:$0x1] %vm666_vm3, %v665_v43 }
 0x249   : > { %775 = dma.vmem_to_hbm [thread:$0]  (%p783_p0), %s675_s30, 16, %s677_s5, [#allocation4]  }
 0x24a   : > { %992 = dma.done.wait (%p783_p0), [#allocation4], 16  }
 0x24b   : > { %994 = vsyncadd (%p783_p0), [#allocation4], 4294967280 }
 0x24c PF: > { %s16_s14 = sadd.s32 1, %s1017_s14   ;;  %s1412_s9 = smov %s1001_s10 }
 0x24d   : > { %p13_p1 = scmp.ge.s32.totalorder %s16_s14, 4   ;;  %s1413_s10 = smov %s1005_s11 }
 0x24e   : > { %s1414_s11 = smov %s1090_s21  ;;  %s1415_s12 = smov %s1013_s13 }
 0x24f   : > { %s1416_s13 = smov %s1418_s16  ;;  %15 = sbr.rel (!%p13_p1) target bundleno = 5 (0x5), region = 72 }
 0x254   :  { %690 = vsyncpa [#allocation3], 1 }
 0x255   :  { %692 = vsyncpa [#allocation3 + $0x1], 1 }
 0x256   :  { %693 = vsyncpa [#allocation4], 1 }
 0x257   :  { %695 = vsyncpa [#allocation4 + $0x1], 1 }

</bundles_post_ra>
